<compile_context>
chip_gen: v6e
topology: v6e:2x2x1
jax: 0.10.0
libtpu: 0.0.40
codegen_flags: <defaults>
</compile_context>

<pallas_src>
import functools
import math

import jax
import jax.numpy as jnp
from jax import lax
from jax.experimental import pallas as pl
from jax.experimental.pallas import tpu as pltpu


# --------------------------- linear projection kernel -----------------------

def _linear_kernel(x_ref, w_ref, b_ref, o_ref):
    # x: (tm, Cin), w: (Cin, tn), b: (1, tn) -> o: (tm, tn)
    acc = jnp.dot(x_ref[...], w_ref[...], preferred_element_type=jnp.float32)
    o_ref[...] = (acc + b_ref[...].astype(jnp.float32)).astype(o_ref.dtype)


def pallas_linear(x, w_t, b, *, tm=256, tn=512):
    """x: (N, Cin) @ w_t: (Cin, Cout) + b: (Cout,) -> (N, Cout).

    Tiled over rows and output columns (both marked 'parallel' so Mosaic can
    shard them across v7x's two TensorCores).  The contraction dim (Cin) stays
    resident per block; tiles are sized so double-buffered inputs + output fit
    comfortably inside the default 32 MiB scoped VMEM on all generations.
    """
    # TODO(synk): add a K-axis grid + f32 VMEM accumulator for very large Cin.
    n, cin = x.shape
    cout = w_t.shape[1]
    tm = n if n <= tm else tm            # full dim or multiple of 8
    tn = cout if cout <= tn else tn      # full dim or multiple of 128
    b2 = b.reshape(1, cout)
    grid = (pl.cdiv(n, tm), pl.cdiv(cout, tn))
    return pl.pallas_call(
        _linear_kernel,
        out_shape=jax.ShapeDtypeStruct((n, cout), x.dtype),
        grid_spec=pltpu.PrefetchScalarGridSpec(
            num_scalar_prefetch=0,
            grid=grid,
            in_specs=[
                pl.BlockSpec((tm, cin), lambda i, j: (i, 0)),
                pl.BlockSpec((cin, tn), lambda i, j: (0, j)),
                pl.BlockSpec((1, tn), lambda i, j: (0, j)),
            ],
            out_specs=pl.BlockSpec((tm, tn), lambda i, j: (i, j)),
        ),
        compiler_params=pltpu.CompilerParams(
            dimension_semantics=("parallel", "parallel")),
        cost_estimate=pl.CostEstimate(
            flops=2 * n * cin * cout,
            transcendentals=0,
            bytes_accessed=4 * (n * cin + cin * cout + n * cout)),
    )(x, w_t, b2)


# ------------------------------ attention kernels ----------------------------

def _mha_kernel(q_ref, k_ref, v_ref, o_ref, *, heads, scale):
    # q: (T, C), k/v: (S, C), o: (T, C) with C = heads * head_dim.
    c = q_ref.shape[-1]
    hd = c // heads
    outs = []
    for h in range(heads):              # heads looped in-kernel -> lane-dense output
        sl = slice(h * hd, (h + 1) * hd)
        q_h = q_ref[:, sl] * scale                       # scale folded into q: O(T*hd)
        k_h = k_ref[:, sl]
        v_h = v_ref[:, sl]
        logits = lax.dot_general(                        # (T, S), f32 accumulate on MXU
            q_h, k_h, (((1,), (1,)), ((), ())),
            preferred_element_type=jnp.float32)
        m = jnp.max(logits, axis=-1, keepdims=True)
        e = jnp.exp(logits - m)                          # f32 softmax math (EUP exp)
        denom = jnp.sum(e, axis=-1, keepdims=True)
        pv = jnp.dot(e.astype(v_h.dtype), v_h,
                     preferred_element_type=jnp.float32)  # (T, hd)
        # Normalize after the PV matmul (O(T*hd), not O(T*S)); reciprocal on EUP.
        outs.append(pv * pl.reciprocal(denom, approx=True))
        # TODO(synk): attention dropout omitted (identity at inference).
    o_ref[...] = jnp.concatenate(outs, axis=-1).astype(o_ref.dtype)
    # TODO(synk): add a KV-tile grid axis with online (flash) softmax for long S.


def _run_mha(arrays, in_specs, *, q_len, kv_len, batch, dim, heads, scale, dtype):
    """Grid walks the batch axis; per-batch q/k/v slabs are picked by index_maps."""
    hd = dim // heads
    kernel = functools.partial(_mha_kernel, heads=heads, scale=scale)
    return pl.pallas_call(
        kernel,
        out_shape=jax.ShapeDtypeStruct((q_len, batch * dim), dtype),
        grid_spec=pltpu.PrefetchScalarGridSpec(
            num_scalar_prefetch=0,
            grid=(batch,),
            in_specs=in_specs,
            out_specs=pl.BlockSpec((q_len, dim), lambda b: (0, b)),
        ),
        compiler_params=pltpu.CompilerParams(
            dimension_semantics=("parallel",)),
        cost_estimate=pl.CostEstimate(
            flops=4 * batch * heads * q_len * kv_len * hd,
            transcendentals=batch * heads * q_len * kv_len,
            bytes_accessed=4 * batch * dim * (2 * q_len + 2 * kv_len)),
    )(*arrays)


def _mha_small_kernel(q_ref, k_ref, v_ref, o_ref, *, scale):
    # Fallback: one (batch*head) slice per grid step. q (1,T,hd), k/v (1,S,hd).
    q = q_ref[0] * scale
    k = k_ref[0]
    v = v_ref[0]
    logits = lax.dot_general(q, k, (((1,), (1,)), ((), ())),
                             preferred_element_type=jnp.float32)
    m = jnp.max(logits, axis=-1, keepdims=True)
    e = jnp.exp(logits - m)
    denom = jnp.sum(e, axis=-1, keepdims=True)
    pv = jnp.dot(e.astype(v.dtype), v, preferred_element_type=jnp.float32)
    o_ref[0] = (pv * pl.reciprocal(denom, approx=True)).astype(o_ref.dtype)


def _run_mha_small(q, k, v, *, q_len, kv_len, batch, dim, heads, scale, dtype):
    """Fallback for lane-unaligned dims (C % 128 != 0)."""
    hd = dim // heads
    bh = batch * heads
    q_bh = q.reshape(q_len, bh, hd).transpose(1, 0, 2)
    k_bh = k.reshape(kv_len, bh, hd).transpose(1, 0, 2)
    v_bh = v.reshape(kv_len, bh, hd).transpose(1, 0, 2)
    out = pl.pallas_call(
        functools.partial(_mha_small_kernel, scale=scale),
        out_shape=jax.ShapeDtypeStruct((bh, q_len, hd), dtype),
        grid_spec=pltpu.PrefetchScalarGridSpec(
            num_scalar_prefetch=0,
            grid=(bh,),
            in_specs=[
                pl.BlockSpec((1, q_len, hd), lambda i: (i, 0, 0)),
                pl.BlockSpec((1, kv_len, hd), lambda i: (i, 0, 0)),
                pl.BlockSpec((1, kv_len, hd), lambda i: (i, 0, 0)),
            ],
            out_specs=pl.BlockSpec((1, q_len, hd), lambda i: (i, 0, 0)),
        ),
        compiler_params=pltpu.CompilerParams(
            dimension_semantics=("parallel",)),
    )(q_bh, k_bh, v_bh)
    return out.transpose(1, 0, 2).reshape(q_len * batch, dim)


# ------------------------------ module wrapper -------------------------------

class MultiheadAttentionPallas:
    def __init__(self, dim, heads, self_attention, attn_drop, key):
        assert dim % heads == 0
        self.self_attention = self_attention
        self.dim = float(dim)
        self.heads = heads
        self.head_dim = dim // heads
        del attn_drop  # TODO(synk): attention dropout is identity at inference.

        ks = jax.random.split(key, 8)
        bound = 1.0 / math.sqrt(dim)

        def init_linear(kw, kb, cout):
            # weights stored transposed: (in, out)
            w_t = jax.random.uniform(kw, (dim, cout), jnp.float32, -bound, bound)
            b = jax.random.uniform(kb, (cout,), jnp.float32, -bound, bound)
            return w_t, b

        self.q_w, self.q_b = init_linear(ks[0], ks[1], dim)
        self.k_w, self.k_b = init_linear(ks[2], ks[3], dim)
        self.v_w, self.v_b = init_linear(ks[4], ks[5], dim)
        self.o_w, self.o_b = init_linear(ks[6], ks[7], dim)

        # Fused projection weights (single activation read, one MXU launch).
        self.qkv_w = jnp.concatenate([self.q_w, self.k_w, self.v_w], axis=1)
        self.qkv_b = jnp.concatenate([self.q_b, self.k_b, self.v_b])
        self.kv_w = jnp.concatenate([self.k_w, self.v_w], axis=1)
        self.kv_b = jnp.concatenate([self.k_b, self.v_b])

    def __call__(self, query, key=None, key_padding_mask=None,
                 decoder_self_atten_mask=None):
        """query: (T, B, C), key: (S, B, C) -> (T, B, C)."""
        # TODO(synk): key_padding_mask / decoder_self_atten_mask are falsy in
        # the reference forward; masking is not applied.
        T, B, C = query.shape
        H = self.heads
        scale = float(1.0 / math.sqrt(self.dim))
        dtype = query.dtype
        lane_aligned = (C % 128 == 0)

        if self.self_attention:
            S = T
            qkv = pallas_linear(query.reshape(T * B, C), self.qkv_w, self.qkv_b)
            if lane_aligned:
                qkv2d = qkv.reshape(T, B * 3 * C)          # free reshape, no transpose
                in_specs = [
                    pl.BlockSpec((T, C), lambda b: (0, 3 * b)),       # q slab
                    pl.BlockSpec((S, C), lambda b: (0, 3 * b + 1)),   # k slab
                    pl.BlockSpec((S, C), lambda b: (0, 3 * b + 2)),   # v slab
                ]
                attn = _run_mha((qkv2d, qkv2d, qkv2d), in_specs,
                                q_len=T, kv_len=S, batch=B, dim=C,
                                heads=H, scale=scale, dtype=dtype)
                attn = attn.reshape(T * B, C)
            else:
                q, k, v = jnp.split(qkv, 3, axis=-1)
                attn = _run_mha_small(q, k, v, q_len=T, kv_len=S, batch=B,
                                      dim=C, heads=H, scale=scale, dtype=dtype)
        else:
            S = key.shape[0]
            q = pallas_linear(query.reshape(T * B, C), self.q_w, self.q_b)
            kv = pallas_linear(key.reshape(S * B, C), self.kv_w, self.kv_b)
            if lane_aligned:
                q2d = q.reshape(T, B * C)
                kv2d = kv.reshape(S, B * 2 * C)
                in_specs = [
                    pl.BlockSpec((T, C), lambda b: (0, b)),
                    pl.BlockSpec((S, C), lambda b: (0, 2 * b)),
                    pl.BlockSpec((S, C), lambda b: (0, 2 * b + 1)),
                ]
                attn = _run_mha((q2d, kv2d, kv2d), in_specs,
                                q_len=T, kv_len=S, batch=B, dim=C,
                                heads=H, scale=scale, dtype=dtype)
                attn = attn.reshape(T * B, C)
            else:
                k, v = jnp.split(kv, 2, axis=-1)
                attn = _run_mha_small(q, k, v, q_len=T, kv_len=S, batch=B,
                                      dim=C, heads=H, scale=scale, dtype=dtype)

        out = pallas_linear(attn, self.o_w, self.o_b)
        return out.reshape(T, B, C)


# ---------------------------------- main --------------------------------------

def _reference(module, query, key=None):
    """Pure-JAX reference for correctness checking."""
    T, B, C = query.shape
    H, hd = module.heads, module.head_dim
    kin = query if module.self_attention else key
    S = kin.shape[0]
    q = query.reshape(T * B, C) @ module.q_w + module.q_b
    k = kin.reshape(S * B, C) @ module.k_w + module.k_b
    v = kin.reshape(S * B, C) @ module.v_w + module.v_b
    qs = q.reshape(T, B * H, hd).transpose(1, 0, 2)
    ks = k.reshape(S, B * H, hd).transpose(1, 0, 2)
    vs = v.reshape(S, B * H, hd).transpose(1, 0, 2)
    logits = jnp.einsum("btd,bsd->bts", qs, ks) / jnp.sqrt(module.dim)
    probs = jax.nn.softmax(logits, axis=-1)
    out = jnp.einsum("bts,bsd->btd", probs, vs)
    out = out.transpose(1, 0, 2).reshape(T * B, C)
    return (out @ module.o_w + module.o_b).reshape(T, B, C)


if __name__ == "__main__":
    # C must be a multiple of 128 for the lane-dense fast path; 128 is still small.
    dim, heads, T, B = 128, 4, 8, 2
    key0 = jax.random.PRNGKey(0)
    k_param, k_q = jax.random.split(key0)

    module = MultiheadAttentionPallas(dim=dim, heads=heads,
                                      self_attention=True, attn_drop=0.0,
                                      key=k_param)
    query = jax.random.normal(k_q, (T, B, dim), dtype=jnp.float32)

    out = module(query, query, None, None)
    out = jax.block_until_ready(out)

    ref = _reference(module, query)
    assert out.shape == (T, B, dim)
    # Loose tolerance: EUP approx-reciprocal normalization + MXU default precision.
    assert jnp.allclose(out, ref, atol=2e-2, rtol=2e-2)

    print("KERNEL_OK")
</pallas_src>

<mosaic_0001>
module attributes {stable_mosaic.version = 11 : i64} {
  func.func @_linear_kernel(%arg0: i32, %arg1: i32, %arg2: memref<16x128xf32, #tpu.memory_space<vmem>>, %arg3: memref<128x384xf32, #tpu.memory_space<vmem>>, %arg4: memref<1x384xf32, #tpu.memory_space<vmem>>, %arg5: memref<16x384xf32, #tpu.memory_space<vmem>>) attributes {dimension_semantics = [#tpu.dimension_semantics<parallel>, #tpu.dimension_semantics<parallel>], iteration_bounds = array<i64: 1, 1>, scalar_prefetch = 0 : i64, scratch_operands = 0 : i64, tpu.core_type = #tpu.core_type<tc>, window_params = [{transform_indices = @transform_0, window_bounds = array<i64: 16, 128>}, {transform_indices = @transform_1, window_bounds = array<i64: 128, 384>}, {transform_indices = @transform_2, window_bounds = array<i64: 1, 384>}, {transform_indices = @transform_3, window_bounds = array<i64: 16, 384>}]} {
    %c0 = arith.constant 0 : index
    %c0_0 = arith.constant 0 : index
    %0 = vector.load %arg2[%c0, %c0_0] : memref<16x128xf32, #tpu.memory_space<vmem>>, vector<16x128xf32>
    %c0_1 = arith.constant 0 : index
    %c0_2 = arith.constant 0 : index
    %1 = vector.load %arg3[%c0_1, %c0_2] : memref<128x384xf32, #tpu.memory_space<vmem>>, vector<128x384xf32>
    %cst = arith.constant dense<0.000000e+00> : vector<16x384xf32>
    %2 = tpu.matmul %0, %1, %cst {dimension_numbers = #tpu.dot_dimension_numbers<[1], [0], [0], [1], [0, 0, 1, 1], [], []>} : vector<16x128xf32>, vector<128x384xf32>, vector<16x384xf32> -> vector<16x384xf32>
    %c0_3 = arith.constant 0 : index
    %c0_4 = arith.constant 0 : index
    %3 = vector.load %arg4[%c0_3, %c0_4] : memref<1x384xf32, #tpu.memory_space<vmem>>, vector<1x384xf32>
    %4 = vector.broadcast %3 : vector<1x384xf32> to vector<16x384xf32>
    %5 = arith.addf %2, %4 : vector<16x384xf32>
    %c0_5 = arith.constant 0 : index
    %c0_6 = arith.constant 0 : index
    %6 = vector.load %arg5[%c0_5, %c0_6] : memref<16x384xf32, #tpu.memory_space<vmem>>, vector<16x384xf32>
    tpu.vector_store %arg5[%c0_5, %c0_6], %5 {strides = array<i32>} : memref<16x384xf32, #tpu.memory_space<vmem>>, vector<16x384xf32>,
    return
  }
  func.func @transform_0(%arg0: i32, %arg1: i32) -> (i32, i32) {
    %c0_i32 = arith.constant 0 : i32
    %c0_i32_0 = arith.constant 0 : i32
    return %arg0, %c0_i32 : i32, i32
  }
  func.func @transform_1(%arg0: i32, %arg1: i32) -> (i32, i32) {
    %c0_i32 = arith.constant 0 : i32
    %c0_i32_0 = arith.constant 0 : i32
    return %c0_i32, %arg1 : i32, i32
  }
  func.func @transform_2(%arg0: i32, %arg1: i32) -> (i32, i32) {
    %c0_i32 = arith.constant 0 : i32
    %c0_i32_0 = arith.constant 0 : i32
    return %c0_i32, %arg1 : i32, i32
  }
  func.func @transform_3(%arg0: i32, %arg1: i32) -> (i32, i32) {
    %c0_i32 = arith.constant 0 : i32
    return %arg0, %arg1 : i32, i32
  }
}

</mosaic_0001>

<bundles_post_ra>
// kernel: tpu_custom_call.1
= control target key start
LH: loop header
LB: loop body
LE: loop exit
PB: predicated region body
PF: predicated region fallthrough
CT: control target
= control target key end

     0   :  { %8 = vsyncpa [#allocation3], 0  ;;  %s461_s0 = inlined_call_operand.hbm [shape: f32[16,128], index: 0, kind: input, shape index: {}]   ;;  %s462_s1 = inlined_call_operand.hbm [shape: f32[128,384], index: 1, kind: input, shape index: {}]   ;;  %s463_s2 = inlined_call_operand.vmem [shape: f32[1,384], index: 2, kind: input, shape index: {}]   ;;  %s464_s3 = inlined_call_operand.hbm [shape: f32[16,384], index: 3, kind: output, shape index: {}]  }
   0x1   :  { %9 = vsyncpa [#allocation6], 0 }
   0x2   :  { %10 = vsyncpa [#allocation4], 0  ;;  %s413_s12 = smov [#allocation2]  }
   0x3   :  { %s16_s13 = sshll.u32 %s413_s12, 4  ;;  %s17_s13 = int_to_ptr.vmem [resolvable:$true] %s16_s13 }
   0x4   :  { %s355_s14 = scalar_lea.vmem %s17_s13, 256  ;;  %p360_p1 = scmp.lt.s32.totalorder %s17_s13, %s17_s13 }
   0x5   :  { %p356_p0 = scmp.ne.s32.totalorder %s17_s13, %s355_s14  ;;  %p361_p2 = scmp.lt.s32.totalorder %s355_s14, %s355_s14 }
   0x7   :  { %p362_p3 = por %p361_p2, %p360_p1 }
   0x9   :  { %p363_p4 = pnand %p362_p3, %p356_p0 }
   0xb   :  { %366 = shalt.err (!%p363_p4)
}
   0xc   :  { %s414_s15 = smov 128   ;;  %s415_s16 = smov 8  }
   0xd   :  { %22 = dma.hbm_to_vmem [thread:$0]  %s461_s0, 256, %s17_s13, [#allocation3], %s414_s15, %s414_s15, %s415_s16  }
   0xe   :  { %s416_s19 = smov [#allocation5]  }
   0xf   :  { %s28_s20 = sshll.u32 %s416_s19, 4  ;;  %s29_s20 = int_to_ptr.vmem [resolvable:$true] %s28_s20 }
  0x10   :  { %s375_s21 = scalar_lea.vmem %s29_s20, 6144  ;;  %p380_p6 = scmp.lt.s32.totalorder %s29_s20, %s29_s20 }
  0x11   :  { %p376_p5 = scmp.ne.s32.totalorder %s29_s20, %s375_s21  ;;  %p381_p7 = scmp.lt.s32.totalorder %s375_s21, %s375_s21 }
  0x13   :  { %p382_p8 = por %p381_p7, %p380_p6 }
  0x15   :  { %p383_p9 = pnand %p382_p8, %p376_p5 }
  0x17   :  { %386 = shalt.err (!%p383_p9)
}
  0x18   :  { %s417_s22 = smov 384   ;;  %s418_s23 = smov 24  }
  0x19   :  { %34 = dma.hbm_to_vmem [thread:$0]  %s462_s1, 6144, %s29_s20, [#allocation6], %s417_s22, %s417_s22, %s418_s23  }
  0x1a   :  { %407 = dma.done.wait [#allocation3], 256  }
  0x1b   :  { %408 = vsyncadd [#allocation3], 4294967040 }
  0x1c   :  { %409 = dma.done.wait [#allocation6], 6144  }
  0x1d   :  { %410 = vsyncadd [#allocation6], 4294961152  ;;  %v419_v0 = vmov 0.0   ;;  %v91_v1 = vld [vmem:[#allocation5 + $0x170] sm:$0xff]  ;;  %v90_v2 = vld [vmem:[#allocation5 + $0x168] sm:$0xff]  ;;  %v95_v51 = vlaneseq  ;;  %s420_s26 = smov [#allocation7]  }
  0x1e   :  { %174 = vmatprep.mubr.f32.mxu0 %v419_v0  ;;  %v88_v3 = vld [vmem:[#allocation5 + $0x158] sm:$0xff]  ;;  %110 = vmatprep.subr.mxu0 %v91_v1  ;;  %v87_v5 = vld [vmem:[#allocation5 + $0x150] sm:$0xff]  ;;  %v85_v6 = vld [vmem:[#allocation5 + $0x140] sm:$0xff]  ;;  %s273_s27 = sshll.u32 %s420_s26, 4  ;;  %s274_s27 = int_to_ptr.vmem [resolvable:$true] %s273_s27 }
  0x1f   :  { %v92_v4 = vld [vmem:[#allocation5 + $0x178] sm:$0xff]  ;;  %111 = vmatpush1.msra.mxu0 %v90_v2  ;;  %v89_v7 = vld [vmem:[#allocation5 + $0x160] sm:$0xff]  ;;  %v86_v9 = vld [vmem:[#allocation5 + $0x148] sm:$0xff]  ;;  %v96_v52 = vshrl.u32 %v95_v51, 7  ;;  %p392_p11 = scmp.lt.s32.totalorder %s274_s27, %s274_s27 }
  0x20   :  { %304 = vmatprep.subr.mxu1 %v92_v4  ;;  %112 = vmatprep.subr.mxu0 %v88_v3  ;;  %v84_v8 = vld [vmem:[#allocation5 + $0x138] sm:$0xff]  ;;  %v82_v10 = vld [vmem:[#allocation5 + $0x128] sm:$0xff]  ;;  %v81_v11 = vld [vmem:[#allocation5 + $0x120] sm:$0xff] }
  0x21   :  { %305 = vmatpush3.msra.mxu1 %v92_v4  ;;  %113 = vmatpush1.msra.mxu0 %v87_v5  ;;  %v83_v12 = vld [vmem:[#allocation5 + $0x130] sm:$0xff]  ;;  %v78_v14 = vld [vmem:[#allocation5 + $0x108] sm:$0xff]  ;;  %v80_v15 = vld [vmem:[#allocation5 + $0x118] sm:$0xff]  ;;  %v97_v53 = vsub.s32 0, %v96_v52  ;;  %v101_v55 = vsub.s32 1, %v96_v52  ;;  %v105_v56 = vsub.s32 2, %v96_v52 }
  0x22   :  { %306 = vmatprep.subr.mxu1 %v89_v7  ;;  %114 = vmatprep.subr.mxu0 %v85_v6  ;;  %v79_v13 = vld [vmem:[#allocation5 + $0x110] sm:$0xff]  ;;  %v76_v16 = vld [vmem:[#allocation5 + $0xf8] sm:$0xff]  ;;  %v77_v18 = vld [vmem:[#allocation5 + $0x100] sm:$0xff] }
  0x23   :  { %307 = vmatpush3.msra.mxu1 %v89_v7  ;;  %115 = vmatpush1.msra.mxu0 %v84_v8  ;;  %v75_v17 = vld [vmem:[#allocation5 + $0xf0] sm:$0xff]  ;;  %v73_v19 = vld [vmem:[#allocation5 + $0xe0] sm:$0xff]  ;;  %v72_v20 = vld [vmem:[#allocation5 + $0xd8] sm:$0xff] }
  0x24   :  { %308 = vmatprep.subr.mxu1 %v86_v9  ;;  %116 = vmatprep.subr.mxu0 %v82_v10  ;;  %v74_v21 = vld [vmem:[#allocation5 + $0xe8] sm:$0xff]  ;;  %v69_v23 = vld [vmem:[#allocation5 + $0xc0] sm:$0xff]  ;;  %v71_v24 = vld [vmem:[#allocation5 + $0xd0] sm:$0xff] }
  0x25   :  { %309 = vmatpush3.msra.mxu1 %v86_v9  ;;  %117 = vmatpush1.msra.mxu0 %v81_v11  ;;  %v70_v22 = vld [vmem:[#allocation5 + $0xc8] sm:$0xff]  ;;  %v67_v25 = vld [vmem:[#allocation5 + $0xb0] sm:$0xff]  ;;  %v68_v27 = vld [vmem:[#allocation5 + $0xb8] sm:$0xff] }
  0x26   :  { %310 = vmatprep.subr.mxu1 %v83_v12  ;;  %118 = vmatprep.subr.mxu0 %v79_v13  ;;  %v66_v26 = vld [vmem:[#allocation5 + $0xa8] sm:$0xff]  ;;  %v64_v28 = vld [vmem:[#allocation5 + $0x98] sm:$0xff]  ;;  %v63_v29 = vld [vmem:[#allocation5 + $0x90] sm:$0xff] }
  0x27   :  { %311 = vmatpush3.msra.mxu1 %v83_v12  ;;  %119 = vmatpush1.msra.mxu0 %v78_v14  ;;  %v65_v30 = vld [vmem:[#allocation5 + $0xa0] sm:$0xff]  ;;  %v60_v32 = vld [vmem:[#allocation5 + $0x78] sm:$0xff]  ;;  %v62_v33 = vld [vmem:[#allocation5 + $0x88] sm:$0xff] }
  0x28   :  { %312 = vmatprep.subr.mxu1 %v80_v15  ;;  %120 = vmatprep.subr.mxu0 %v76_v16  ;;  %v61_v31 = vld [vmem:[#allocation5 + $0x80] sm:$0xff]  ;;  %v58_v34 = vld [vmem:[#allocation5 + $0x68] sm:$0xff]  ;;  %v59_v36 = vld [vmem:[#allocation5 + $0x70] sm:$0xff] }
  0x29   :  { %313 = vmatpush3.msra.mxu1 %v80_v15  ;;  %121 = vmatpush1.msra.mxu0 %v75_v17  ;;  %v57_v35 = vld [vmem:[#allocation5 + $0x60] sm:$0xff]  ;;  %v55_v37 = vld [vmem:[#allocation5 + $0x50] sm:$0xff]  ;;  %v54_v38 = vld [vmem:[#allocation5 + $0x48] sm:$0xff] }
  0x2a   :  { %314 = vmatprep.subr.mxu1 %v77_v18  ;;  %122 = vmatprep.subr.mxu0 %v73_v19  ;;  %v56_v39 = vld [vmem:[#allocation5 + $0x58] sm:$0xff]  ;;  %v51_v41 = vld [vmem:[#allocation5 + $0x30] sm:$0xff]  ;;  %v53_v42 = vld [vmem:[#allocation5 + $0x40] sm:$0xff] }
  0x2b   :  { %315 = vmatpush3.msra.mxu1 %v77_v18  ;;  %123 = vmatpush1.msra.mxu0 %v72_v20  ;;  %v52_v40 = vld [vmem:[#allocation5 + $0x38] sm:$0xff]  ;;  %v49_v43 = vld [vmem:[#allocation5 + $0x20] sm:$0xff]  ;;  %v50_v45 = vld [vmem:[#allocation5 + $0x28] sm:$0xff] }
  0x2c   :  { %316 = vmatprep.subr.mxu1 %v74_v21  ;;  %124 = vmatprep.subr.mxu0 %v70_v22  ;;  %v48_v44 = vld [vmem:[#allocation5 + $0x18] sm:$0xff]  ;;  %v46_v46 = vld [vmem:[#allocation5 + $0x8] sm:$0xff]  ;;  %v45_v47 = vld [vmem:[#allocation5] sm:$0xff] }
  0x2d   :  { %317 = vmatpush3.msra.mxu1 %v74_v21  ;;  %125 = vmatpush1.msra.mxu0 %v69_v23  ;;  %v47_v48 = vld [vmem:[#allocation5 + $0x10] sm:$0xff]  ;;  %v44_v50 = vld [vmem:[#allocation2 + $0x8] sm:$0xff] }
  0x2e   :  { %318 = vmatprep.subr.mxu1 %v71_v24  ;;  %126 = vmatprep.subr.mxu0 %v67_v25  ;;  %v43_v49 = vld [vmem:[#allocation2] sm:$0xff] }
  0x2f   :  { %319 = vmatpush3.msra.mxu1 %v71_v24  ;;  %127 = vmatpush1.msra.mxu0 %v66_v26  ;;  %v93_v54 = vld [vmem:[%s463_s2] sm:$0x7]  ;;  %s387_s2 = scalar_lea.vmem %s274_s27, 768 }
  0x30   :  { %320 = vmatprep.subr.mxu1 %v68_v27  ;;  %128 = vmatprep.subr.mxu0 %v64_v28  ;;  %v98_v57 = vrot.slane %v93_v54, %v97_v53  ;;  %v102_v58 = vrot.slane %v93_v54, %v101_v55  ;;  %v106_v59 = vrot.slane %v93_v54, %v105_v56  ;;  %p388_p10 = scmp.ne.s32.totalorder %s274_s27, %s387_s2  ;;  %p393_p12 = scmp.lt.s32.totalorder %s387_s2, %s387_s2 }
  0x31   :  { %321 = vmatpush3.msra.mxu1 %v68_v27  ;;  %129 = vmatpush1.msra.mxu0 %v63_v29 }
  0x32   :  { %322 = vmatprep.subr.mxu1 %v65_v30  ;;  %130 = vmatprep.subr.mxu0 %v61_v31  ;;  %p394_p13 = por %p393_p12, %p392_p11 }
  0x33   :  { %323 = vmatpush3.msra.mxu1 %v65_v30  ;;  %131 = vmatpush1.msra.mxu0 %v60_v32 }
  0x34   :  { %324 = vmatprep.subr.mxu1 %v62_v33  ;;  %132 = vmatprep.subr.mxu0 %v58_v34  ;;  %p395_p0 = pnand %p394_p13, %p388_p10 }
  0x35   :  { %325 = vmatpush3.msra.mxu1 %v62_v33  ;;  %133 = vmatpush1.msra.mxu0 %v57_v35 }
  0x36   :  { %326 = vmatprep.subr.mxu1 %v59_v36  ;;  %134 = vmatprep.subr.mxu0 %v55_v37 }
  0x37   :  { %327 = vmatpush3.msra.mxu1 %v59_v36  ;;  %135 = vmatpush1.msra.mxu0 %v54_v38 }
  0x38   :  { %328 = vmatprep.subr.mxu1 %v56_v39  ;;  %136 = vmatprep.subr.mxu0 %v52_v40 }
  0x39   :  { %329 = vmatpush3.msra.mxu1 %v56_v39  ;;  %137 = vmatpush1.msra.mxu0 %v51_v41 }
  0x3a   :  { %330 = vmatprep.subr.mxu1 %v53_v42  ;;  %138 = vmatprep.subr.mxu0 %v49_v43 }
  0x3b   :  { %331 = vmatpush3.msra.mxu1 %v53_v42  ;;  %139 = vmatpush1.msra.mxu0 %v48_v44 }
  0x3c   :  { %332 = vmatprep.subr.mxu1 %v50_v45  ;;  %140 = vmatprep.subr.mxu0 %v46_v46 }
  0x3d   :  { %333 = vmatpush3.msra.mxu1 %v50_v45  ;;  %141 = vmatpush1.msra.mxu0 %v45_v47 }
  0x3e   :  { %334 = vmatprep.subr.mxu1 %v47_v48  ;;  %175 = vmatmul.mubr.f32.vlgmr.msra.gmra.mxu0 %v43_v49 }
  0x3f   :  { %335 = vmatpush3.msra.mxu1 %v47_v48  ;;  %336 = vmatprep.mubr.f32.mxu1 %v43_v49 }
  0x40   :  { %180 = vmatprep.mubr.f32.mxu0 %v419_v0  ;;  %337 = vmatmul.mubr.f32.vlgmr.msra.gmra.mxu1 %v44_v50 }
  0x42   :  { %181 = vmatmul.mubr.f32.gmra.mxu0 %v44_v50 }
  0xfe   :  { %v176_v60 = vpop.f32.mrf.mxu0 }
  0xff   :  { %v177_v61 = vadd.f32 %v176_v60, %v98_v57 }
 0x100   :  { %v178_v62 = vpop.f32.mrf.mxu0  ;;  %v338_v63 = vpop.f32.mrf.mxu1 }
 0x101   :  { %262 = vst [vmem:[#allocation7] sm:$0xff] %v177_v61  ;;  %v179_v0 = vadd.f32 %v178_v62, %v102_v58  ;;  %v259_v1 = vadd.f32 %v338_v63, %v106_v59 }
 0x102   :  { %v182_v2 = vpop.f32.mrf.mxu0  ;;  %v253_v3 = vpop.f32.mrf.mxu1 }
 0x103   :  { %263 = vst [vmem:[#allocation7 + $0x8] sm:$0xff] %v179_v0  ;;  %267 = vst [vmem:[#allocation7 + $0x28] sm:$0xff] %v259_v1  ;;  %v183_v4 = vadd.f32 %v182_v2, %v98_v57  ;;  %v254_v5 = vadd.f32 %v253_v3, %v106_v59 }
 0x104   :  { %v184_v6 = vpop.f32.mrf.mxu0 }
 0x105   :  { %265 = vst [vmem:[#allocation7 + $0x18] sm:$0xff] %v183_v4  ;;  %264 = vst [vmem:[#allocation7 + $0x10] sm:$0xff] %v254_v5  ;;  %v185_v7 = vadd.f32 %v184_v6, %v102_v58 }
 0x107   :  { %266 = vst [vmem:[#allocation7 + $0x20] sm:$0xff] %v185_v7 }
 0x108   :  { %398 = shalt.err (!%p395_p0)
}
 0x109   :  { %279 = dma.vmem_to_hbm [thread:$0]  %s274_s27, 768, %s464_s3, [#allocation4], %s417_s22, %s417_s22, %s418_s23  }
 0x10a   :  { %411 = dma.done.wait [#allocation4], 768  }
 0x10b   :  { %412 = vsyncadd [#allocation4], 4294966528 }
 0x10c   :  { %283 = vsyncpa [#allocation3], 1 }
 0x10d   :  { %284 = vsyncpa [#allocation6], 1 }
 0x10e   :  { %285 = vsyncpa [#allocation4], 1 }

</bundles_post_ra>
